<compile_context>
chip_gen: v7x
topology: tpu7x:2x2x1
jax: 0.10.0
libtpu: 0.0.40
codegen_flags: <defaults>
</compile_context>

<pallas_src>
import jax
import jax.numpy as jnp
from jax.experimental import pallas as pl
from jax.experimental.pallas import tpu as pltpu


# ----------------------------------------------------------------------------
# Fused kernel
# ----------------------------------------------------------------------------
def _decoder_block_kernel(x_ref, sk_ref, wd_ref, wa_ref, wb_ref, wc_ref, sb_ref,
                          o_ref, zbuf):
    # x_ref : (TN, W, Cin)          bf16  input sequences (channels last)
    # sk_ref: (TN, W+4, 2*Cs)       bf16  skip, per row t: [skip@2t | skip@2t+1];
    #                                     rows 0..1 and W+2..W+3 are zero halo bands
    # wd_ref: (Cin, 2*Cout)         bf16  ConvTranspose1d taps, columns [even | odd]
    # wa_ref: (3, 2*Cout, 2*Cout)   bf16  conv2[0] deconv-part taps for prev/cur/next rows,
    #                                     merged over output phases along N
    # wb_ref: (3, 2*Cs, 2*Cout)     bf16  conv2[0] skip-part taps (same structure)
    # wc_ref: (3, 2*Cout, 2*Cout)   bf16  conv2[1] taps (same structure)
    # sb_ref: (6, 2*Cout)           f32   [s1, b1, s2, b2, s3, b3] folded BN scale/shift,
    #                                     duplicated over the [even | odd] pair
    # o_ref : (TN, W, 2*Cout)       bf16  output, per row t: [out@2t | out@2t+1]
    # zbuf  : (TN, W+4, 2*Cout)     bf16  VMEM stream scratch, reused across stages
    f32 = jnp.float32
    TN, W, Cin = x_ref.shape
    Cout2 = o_ref.shape[2]
    Cs2 = sk_ref.shape[2]
    M = TN * W

    s1 = sb_ref[0:1, :]; b1 = sb_ref[1:2, :]
    s2 = sb_ref[2:3, :]; b2 = sb_ref[3:4, :]
    s3 = sb_ref[4:5, :]; b3 = sb_ref[5:6, :]

    # zero the 2-row halo bands (aligned to bf16 sublane packing)
    zhalo = jnp.zeros((TN, 2, Cout2), zbuf.dtype)
    zbuf[:, 0:2, :] = zhalo
    zbuf[:, W + 2:W + 4, :] = zhalo

    def mm(a, w):  # bf16 operands on the MXU, f32 accumulate
        return jnp.dot(a, w, preferred_element_type=f32)

    # ---- stage 1: ConvTranspose1d(k=2, s=2) + BN1 + ReLU, both phases in ONE matmul ----------
    x2 = x_ref[...].reshape(M, Cin)
    y = mm(x2, wd_ref[...])                                  # (M, 2*Cout) = [even | odd]
    y = jnp.maximum(y * s1 + b1, 0.0).astype(zbuf.dtype)
    zbuf[:, 2:W + 2, :] = y.reshape(TN, W, Cout2)

    # ---- stage 2: Conv1d(k=3, pad=1) over [deconv | skip] channels + BN2 + ReLU ---------------
    zp = zbuf[:, 1:W + 1, :].reshape(M, Cout2)               # interleaved z[2t-2] | z[2t-1]
    zc = zbuf[:, 2:W + 2, :].reshape(M, Cout2)               #             z[2t]   | z[2t+1]
    zn = zbuf[:, 3:W + 3, :].reshape(M, Cout2)               #             z[2t+2] | z[2t+3]
    sp = sk_ref[:, 1:W + 1, :].reshape(M, Cs2)
    sc = sk_ref[:, 2:W + 2, :].reshape(M, Cs2)
    sn = sk_ref[:, 3:W + 3, :].reshape(M, Cs2)
    u = (mm(zp, wa_ref[0]) + mm(zc, wa_ref[1]) + mm(zn, wa_ref[2])
         + mm(sp, wb_ref[0]) + mm(sc, wb_ref[1]) + mm(sn, wb_ref[2]))
    u = jnp.maximum(u * s2 + b2, 0.0).astype(zbuf.dtype)
    zbuf[:, 2:W + 2, :] = u.reshape(TN, W, Cout2)

    # ---- stage 3: Conv1d(k=3, pad=1) + BN3 + ReLU ---------------------------------------------
    zp = zbuf[:, 1:W + 1, :].reshape(M, Cout2)
    zc = zbuf[:, 2:W + 2, :].reshape(M, Cout2)
    zn = zbuf[:, 3:W + 3, :].reshape(M, Cout2)
    v = mm(zp, wc_ref[0]) + mm(zc, wc_ref[1]) + mm(zn, wc_ref[2])
    o_ref[...] = jnp.maximum(v * s3 + b3, 0.0).reshape(TN, W, Cout2).astype(o_ref.dtype)


# ----------------------------------------------------------------------------
# Glue helpers
# ----------------------------------------------------------------------------
def fold_bn(gamma, beta, mean, var, eps=1e-5):
    scale = gamma / jnp.sqrt(var + eps)
    shift = beta - mean * scale
    return scale, shift


def _interp_matrix(out_size, in_size, dtype=jnp.float32):
    # torch F.interpolate(mode='bilinear', align_corners=False) source coordinates
    o = jnp.arange(out_size, dtype=jnp.float32)
    src = (o + 0.5) * (in_size / out_size) - 0.5
    src = jnp.clip(src, 0.0, in_size - 1)
    i0 = jnp.floor(src).astype(jnp.int32)
    i1 = jnp.minimum(i0 + 1, in_size - 1)
    w = src - i0.astype(jnp.float32)
    return (jax.nn.one_hot(i0, in_size, dtype=dtype) * (1.0 - w)[:, None]
            + jax.nn.one_hot(i1, in_size, dtype=dtype) * w[:, None])


def bilinear_resize_matmul(x, out_h, out_w, precision=None):
    """(bs, C, Hs, Ws) -> (bs, C, out_h, out_w) bilinear resize as two dense matmuls."""
    ah = _interp_matrix(out_h, x.shape[2])
    aw = _interp_matrix(out_w, x.shape[3])
    y = jnp.einsum('hp,bcpq->bchq', ah, x, precision=precision)
    return jnp.einsum('bchq,wq->bchw', y, aw, precision=precision)


def _skip_streams(skip, h, w):
    """Bilinear resize to (H, 2W), even/odd output-position split and the 2-row zero halo bands,
    all folded into the interpolation matrices.  Returns (bs, H, W+4, 2*Cs)."""
    ah = _interp_matrix(h, skip.shape[2])                     # (H, Hs)
    aw = _interp_matrix(2 * w, skip.shape[3])                 # (2W, Ws)
    awe = jnp.pad(aw[0::2], ((2, 2), (0, 0)))                 # (W+4, Ws), zero halo rows
    awo = jnp.pad(aw[1::2], ((2, 2), (0, 0)))
    tmp = jnp.einsum('hp,bcpq->bhcq', ah, skip)               # (bs, H, Cs, Ws)
    se = jnp.einsum('bhcq,wq->bhwc', tmp, awe)                # (bs, H, W+4, Cs)  skip @ 2t
    so = jnp.einsum('bhcq,wq->bhwc', tmp, awo)                # (bs, H, W+4, Cs)  skip @ 2t+1
    return jnp.concatenate([se, so], axis=-1)                 # (bs, H, W+4, 2*Cs)


def _vmem_limit_bytes():
    """Per-generation VMEM ceiling: ~70% of physical per-core VMEM, clamped to [32, 96] MiB.
    v7x (64 MiB physical) -> ~45 MiB; v5e/v6e (128 MiB) -> ~90 MiB; conservative fallback."""
    phys = 64 * 1024 * 1024
    try:
        phys = int(pltpu.get_tpu_info().vmem_capacity_bytes)
    except Exception:
        pass
    return max(32 * 1024 * 1024, min(int(phys * 0.70), 96 * 1024 * 1024))


def _pick_block_rows(n_rows, w, cin, cs, cout, budget):
    """Largest divisor of n_rows whose (lane/sublane-padded) VMEM footprint fits the budget,
    preferring >= 4 grid steps (>= 2 per TensorCore after v7x megacore sharding), then >= 2."""
    def rup(a, m):
        return ((a + m - 1) // m) * m

    cs2, cout2 = 2 * cs, 2 * cout

    def fits(tn):
        # bf16 blocks: sublane tile 16, lane tile 128; f32 scale/shift: 8 x 128
        x_blk = tn * rup(w, 16) * rup(cin, 128) * 2
        sk_blk = tn * rup(w + 4, 16) * rup(cs2, 128) * 2
        o_blk = tn * rup(w, 16) * rup(cout2, 128) * 2
        wts = (rup(cin, 16) * rup(cout2, 128)
               + 2 * 3 * rup(cout2, 16) * rup(cout2, 128)
               + 3 * rup(cs2, 16) * rup(cout2, 128)) * 2 + rup(8, 8) * rup(cout2, 128) * 4
        zb = tn * rup(w + 4, 16) * rup(cout2, 128) * 2
        # BlockSpec double-buffers every in/out block; scratch is single-buffered.
        return 2 * (x_blk + sk_blk + o_blk + wts) + zb <= budget

    divs = [d for d in range(1, n_rows + 1) if n_rows % d == 0]
    for min_steps in (4, 2, 1):
        ok = [d for d in divs if (n_rows // d) >= min_steps and fits(d)]
        if ok:
            return max(ok)
    return 1


# ----------------------------------------------------------------------------
# DecoderBlock1D forward (use_batchnorm=True, use_resblock=False)
# ----------------------------------------------------------------------------
def decoder_block_1d(x, skip, params):
    """x: (bs, Cin, H, W) NCHW, skip: (bs, Cs, Hs, Ws).  Returns (bs, Cout, H, 2W) f32."""
    # TODO(synk): skip=None variant (no channel concat) is not implemented in the fused kernel.
    assert skip is not None
    bs, cin, h, w = x.shape
    cs = skip.shape[1]
    cout = params["wt"].shape[1]
    n, l = bs * h, 2 * w
    cout2, cs2 = 2 * cout, 2 * cs
    bf16, f32 = jnp.bfloat16, jnp.float32

    # fold BatchNorm (eval mode) into per-channel scale/shift; fold the deconv bias into shift1;
    # duplicate over the [even | odd] channel pairing used inside the kernel.
    s1, sh1 = fold_bn(params["bn1_g"], params["bn1_b"], params["bn1_m"], params["bn1_v"])
    sh1 = params["wt_bias"] * s1 + sh1
    s2, sh2 = fold_bn(params["bn2_g"], params["bn2_b"], params["bn2_m"], params["bn2_v"])
    s3, sh3 = fold_bn(params["bn3_g"], params["bn3_b"], params["bn3_m"], params["bn3_v"])
    dup = lambda v: jnp.concatenate([v, v], axis=0)
    sb = jnp.stack([dup(s1), dup(sh1), dup(s2), dup(sh2), dup(s3), dup(sh3)], 0).astype(f32)

    # ConvTranspose1d taps -> one (Cin, 2*Cout) matrix producing [even | odd] in a single matmul
    wd = jnp.concatenate([params["wt"][:, :, 0], params["wt"][:, :, 1]], axis=1).astype(bf16)

    # Conv taps, merged over the two output phases along N so each shifted row-slice feeds ONE
    # matmul of width 2*Cout.  Per-position channel layout: [even-phase | odd-phase].
    def _pair(tl, tr, bl, br):
        return jnp.concatenate([jnp.concatenate([tl, tr], axis=1),
                                jnp.concatenate([bl, br], axis=1)], axis=0)

    a0, a1, a2 = [params["w_c1"][:, :cout, k].T for k in range(3)]     # (Cout, Cout)
    k0, k1, k2 = [params["w_c1"][:, cout:, k].T for k in range(3)]     # (Cs,   Cout)
    c0, c1, c2 = [params["w_c2"][:, :, k].T for k in range(3)]         # (Cout, Cout)
    zc_, zs_ = jnp.zeros((cout, cout), f32), jnp.zeros((cs, cout), f32)
    wa = jnp.stack([_pair(zc_, zc_, a0, zc_), _pair(a1, a0, a2, a1),
                    _pair(zc_, a2, zc_, zc_)], 0).astype(bf16)          # (3, 2Cout, 2Cout)
    wb = jnp.stack([_pair(zs_, zs_, k0, zs_), _pair(k1, k0, k2, k1),
                    _pair(zs_, k2, zs_, zs_)], 0).astype(bf16)          # (3, 2Cs,   2Cout)
    wc = jnp.stack([_pair(zc_, zc_, c0, zc_), _pair(c1, c0, c2, c1),
                    _pair(zc_, c2, zc_, zc_)], 0).astype(bf16)          # (3, 2Cout, 2Cout)

    # activations: channels-last, bf16 on the hot path
    x_cl = jnp.transpose(x, (0, 2, 3, 1)).reshape(n, w, cin).astype(bf16)
    sk_eo = _skip_streams(skip.astype(f32), h, w).reshape(n, w + 4, cs2).astype(bf16)

    limit = _vmem_limit_bytes()
    tn = _pick_block_rows(n, w, cin, cs, cout, budget=int(limit * 0.75))
    wp4 = w + 4

    out = pl.pallas_call(
        _decoder_block_kernel,
        out_shape=jax.ShapeDtypeStruct((n, w, cout2), bf16),
        grid_spec=pltpu.PrefetchScalarGridSpec(
            num_scalar_prefetch=0,
            grid=(n // tn,),
            in_specs=[
                pl.BlockSpec((tn, w, cin), lambda i: (i, 0, 0)),
                pl.BlockSpec((tn, wp4, cs2), lambda i: (i, 0, 0)),
                pl.BlockSpec((cin, cout2), lambda i: (0, 0)),
                pl.BlockSpec((3, cout2, cout2), lambda i: (0, 0, 0)),
                pl.BlockSpec((3, cs2, cout2), lambda i: (0, 0, 0)),
                pl.BlockSpec((3, cout2, cout2), lambda i: (0, 0, 0)),
                pl.BlockSpec((6, cout2), lambda i: (0, 0)),
            ],
            out_specs=pl.BlockSpec((tn, w, cout2), lambda i: (i, 0, 0)),
            scratch_shapes=[pltpu.VMEM((tn, wp4, cout2), bf16)],
        ),
        compiler_params=pltpu.CompilerParams(
            dimension_semantics=("parallel",),
            vmem_limit_bytes=limit,
        ),
    )(x_cl, sk_eo, wd, wa, wb, wc, sb)

    # (N, W, [even|odd]*Cout) -> (N, 2W, Cout) is a pure reshape; one transpose/cast to f32 NCHW.
    out_cl = out.reshape(n, l, cout)
    return jnp.transpose(out_cl.reshape(bs, h, l, cout), (0, 3, 1, 2)).astype(f32)


# ----------------------------------------------------------------------------
# Pure-JAX reference (same math, f32, HIGHEST precision) for a correctness check
# ----------------------------------------------------------------------------
def _reference(x, skip, params):
    hp = jax.lax.Precision.HIGHEST
    bs, cin, h, w = x.shape
    cout = params["wt"].shape[1]
    n, l = bs * h, 2 * w
    x1d = jnp.transpose(x, (0, 2, 3, 1)).reshape(n, w, cin)

    s1, b1 = fold_bn(params["bn1_g"], params["bn1_b"], params["bn1_m"], params["bn1_v"])
    b1 = params["wt_bias"] * s1 + b1
    y0 = jnp.einsum('nwc,co->nwo', x1d, params["wt"][:, :, 0], precision=hp)
    y1 = jnp.einsum('nwc,co->nwo', x1d, params["wt"][:, :, 1], precision=hp)
    y = jnp.stack([y0, y1], axis=2).reshape(n, l, cout)
    y = jnp.maximum(y * s1 + b1, 0.0)

    skip_r = bilinear_resize_matmul(skip, h, l, precision=hp)
    skip_cl = jnp.transpose(skip_r, (0, 2, 3, 1)).reshape(n, l, -1)
    z = jnp.concatenate([y, skip_cl], axis=-1)

    def conv3(zz, wt, s, b):
        zp = jnp.pad(zz, ((0, 0), (1, 1), (0, 0)))
        o = (jnp.einsum('nlc,oc->nlo', zp[:, :-2, :], wt[:, :, 0], precision=hp)
             + jnp.einsum('nlc,oc->nlo', zp[:, 1:-1, :], wt[:, :, 1], precision=hp)
             + jnp.einsum('nlc,oc->nlo', zp[:, 2:, :], wt[:, :, 2], precision=hp))
        return jnp.maximum(o * s + b, 0.0)

    s2, b2 = fold_bn(params["bn2_g"], params["bn2_b"], params["bn2_m"], params["bn2_v"])
    s3, b3 = fold_bn(params["bn3_g"], params["bn3_b"], params["bn3_m"], params["bn3_v"])
    z = conv3(z, params["w_c1"], s2, b2)
    z = conv3(z, params["w_c2"], s3, b3)
    return jnp.transpose(z.reshape(bs, h, l, cout), (0, 3, 1, 2))


# ----------------------------------------------------------------------------
# Deterministic parameter construction
# ----------------------------------------------------------------------------
def make_params(key, in_channels, skip_channels, out_channels):
    ks = jax.random.split(key, 12)
    f32 = jnp.float32

    def nrm(k, shape, scale=0.1):
        return (scale * jax.random.normal(k, shape)).astype(f32)

    params = {
        # ConvTranspose1d(in, out, k=2, s=2): weight (in, out, 2), bias (out,)
        "wt": nrm(ks[0], (in_channels, out_channels, 2)),
        "wt_bias": nrm(ks[1], (out_channels,)),
        # Conv1d(out+skip, out, k=3, pad=1, bias=False): weight (out, out+skip, 3)
        "w_c1": nrm(ks[2], (out_channels, out_channels + skip_channels, 3)),
        # Conv1d(out, out, k=3, pad=1, bias=False)
        "w_c2": nrm(ks[3], (out_channels, out_channels, 3)),
        # BatchNorm1d(out) x3, eval-mode stats
        "bn1_g": (1.0 + 0.1 * jax.random.normal(ks[4], (out_channels,))).astype(f32),
        "bn1_b": nrm(ks[5], (out_channels,)),
        "bn1_m": nrm(ks[6], (out_channels,)),
        "bn1_v": (0.5 + jnp.abs(jax.random.normal(ks[7], (out_channels,))) * 0.5).astype(f32),
        "bn2_g": (1.0 + 0.1 * jax.random.normal(ks[8], (out_channels,))).astype(f32),
        "bn2_b": nrm(ks[9], (out_channels,)),
        "bn2_m": nrm(ks[10], (out_channels,)),
        "bn2_v": (0.5 + jnp.abs(jax.random.normal(ks[11], (out_channels,))) * 0.5).astype(f32),
    }
    params["bn3_g"] = params["bn2_g"][::-1]
    params["bn3_b"] = params["bn2_b"][::-1]
    params["bn3_m"] = params["bn2_m"][::-1]
    params["bn3_v"] = params["bn2_v"][::-1]
    return params


if __name__ == "__main__":
    key = jax.random.PRNGKey(0)
    k_x, k_s, k_p = jax.random.split(key, 3)

    bs, in_channels, skip_channels, out_channels = 2, 8, 4, 8
    H, W = 4, 8           # x spatial (NCHW)
    Hs, Ws = 6, 10        # skip spatial (bilinearly resized to (H, 2W))

    x = jax.random.normal(k_x, (bs, in_channels, H, W), dtype=jnp.float32)
    skip = jax.random.normal(k_s, (bs, skip_channels, Hs, Ws), dtype=jnp.float32)
    params = make_params(k_p, in_channels, skip_channels, out_channels)

    out = jax.block_until_ready(decoder_block_1d(x, skip, params))
    assert out.shape == (bs, out_channels, H, 2 * W), out.shape

    ref = jax.block_until_ready(_reference(x, skip, params))
    err = float(jnp.max(jnp.abs(out - ref)))
    assert err < 5e-2, f"max abs error vs reference: {err}"
    print("KERNEL_OK")
</pallas_src>

<mosaic_0001>
module attributes {stable_mosaic.version = 11 : i64} {
  func.func @_decoder_block_kernel(%arg0: i32, %arg1: memref<2x8x8xbf16, #tpu.memory_space<vmem>>, %arg2: memref<2x12x8xbf16, #tpu.memory_space<vmem>>, %arg3: memref<8x16xbf16, #tpu.memory_space<vmem>>, %arg4: memref<3x16x16xbf16, #tpu.memory_space<vmem>>, %arg5: memref<3x8x16xbf16, #tpu.memory_space<vmem>>, %arg6: memref<3x16x16xbf16, #tpu.memory_space<vmem>>, %arg7: memref<6x16xf32, #tpu.memory_space<vmem>>, %arg8: memref<2x8x16xbf16, #tpu.memory_space<vmem>>, %arg9: memref<2x12x16xbf16, #tpu.memory_space<vmem>>) attributes {dimension_semantics = [#tpu.dimension_semantics<parallel>], iteration_bounds = array<i64: 4>, scalar_prefetch = 0 : i64, scratch_operands = 1 : i64, tpu.core_type = #tpu.core_type<tc>, window_params = [{transform_indices = @transform_0, window_bounds = array<i64: 2, 8, 8>}, {transform_indices = @transform_1, window_bounds = array<i64: 2, 12, 8>}, {pipeline_mode = #tpu.pipeline_mode<synchronous>, transform_indices = @transform_2, window_bounds = array<i64: 8, 16>}, {pipeline_mode = #tpu.pipeline_mode<synchronous>, transform_indices = @transform_3, window_bounds = array<i64: 3, 16, 16>}, {pipeline_mode = #tpu.pipeline_mode<synchronous>, transform_indices = @transform_4, window_bounds = array<i64: 3, 8, 16>}, {pipeline_mode = #tpu.pipeline_mode<synchronous>, transform_indices = @transform_5, window_bounds = array<i64: 3, 16, 16>}, {pipeline_mode = #tpu.pipeline_mode<synchronous>, transform_indices = @transform_6, window_bounds = array<i64: 6, 16>}, {transform_indices = @transform_7, window_bounds = array<i64: 2, 8, 16>}]} {
    %c0 = arith.constant 0 : index
    %c0_0 = arith.constant 0 : index
    %0 = vector.load %arg7[%c0, %c0_0] : memref<6x16xf32, #tpu.memory_space<vmem>>, vector<1x16xf32>
    %c1 = arith.constant 1 : index
    %c0_1 = arith.constant 0 : index
    %1 = vector.load %arg7[%c1, %c0_1] : memref<6x16xf32, #tpu.memory_space<vmem>>, vector<1x16xf32>
    %c2 = arith.constant 2 : index
    %c0_2 = arith.constant 0 : index
    %2 = vector.load %arg7[%c2, %c0_2] : memref<6x16xf32, #tpu.memory_space<vmem>>, vector<1x16xf32>
    %c3 = arith.constant 3 : index
    %c0_3 = arith.constant 0 : index
    %3 = vector.load %arg7[%c3, %c0_3] : memref<6x16xf32, #tpu.memory_space<vmem>>, vector<1x16xf32>
    %c4 = arith.constant 4 : index
    %c0_4 = arith.constant 0 : index
    %4 = vector.load %arg7[%c4, %c0_4] : memref<6x16xf32, #tpu.memory_space<vmem>>, vector<1x16xf32>
    %c5 = arith.constant 5 : index
    %c0_5 = arith.constant 0 : index
    %5 = vector.load %arg7[%c5, %c0_5] : memref<6x16xf32, #tpu.memory_space<vmem>>, vector<1x16xf32>
    %cst = arith.constant 0.000000e+00 : bf16
    %6 = vector.broadcast %cst : bf16 to vector<2x2x16xbf16>
    %c0_6 = arith.constant 0 : index
    %c0_7 = arith.constant 0 : index
    %c0_8 = arith.constant 0 : index
    %7 = vector.load %arg9[%c0_6, %c0_7, %c0_8] : memref<2x12x16xbf16, #tpu.memory_space<vmem>>, vector<2x2x16xbf16>
    tpu.vector_store %arg9[%c0_6, %c0_7, %c0_8], %6 {strides = array<i32>} : memref<2x12x16xbf16, #tpu.memory_space<vmem>>, vector<2x2x16xbf16>,
    %c0_9 = arith.constant 0 : index
    %c10 = arith.constant 10 : index
    %c0_10 = arith.constant 0 : index
    %8 = vector.load %arg9[%c0_9, %c10, %c0_10] : memref<2x12x16xbf16, #tpu.memory_space<vmem>>, vector<2x2x16xbf16>
    tpu.vector_store %arg9[%c0_9, %c10, %c0_10], %6 {strides = array<i32>} : memref<2x12x16xbf16, #tpu.memory_space<vmem>>, vector<2x2x16xbf16>,
    %c0_11 = arith.constant 0 : index
    %c0_12 = arith.constant 0 : index
    %c0_13 = arith.constant 0 : index
    %9 = vector.load %arg1[%c0_11, %c0_12, %c0_13] : memref<2x8x8xbf16, #tpu.memory_space<vmem>>, vector<2x8x8xbf16>
    %10 = vector.shape_cast %9 : vector<2x8x8xbf16> to vector<16x8xbf16>
    %c0_14 = arith.constant 0 : index
    %c0_15 = arith.constant 0 : index
    %11 = vector.load %arg3[%c0_14, %c0_15] : memref<8x16xbf16, #tpu.memory_space<vmem>>, vector<8x16xbf16>
    %cst_16 = arith.constant dense<0.000000e+00> : vector<16x16xf32>
    %12 = tpu.matmul %10, %11, %cst_16 {dimension_numbers = #tpu.dot_dimension_numbers<[1], [0], [0], [1], [0, 0, 1, 1], [], []>} : vector<16x8xbf16>, vector<8x16xbf16>, vector<16x16xf32> -> vector<16x16xf32>
    %13 = vector.broadcast %0 : vector<1x16xf32> to vector<16x16xf32>
    %14 = arith.mulf %12, %13 : vector<16x16xf32>
    %15 = vector.broadcast %1 : vector<1x16xf32> to vector<16x16xf32>
    %16 = arith.addf %14, %15 : vector<16x16xf32>
    %cst_17 = arith.constant 0.000000e+00 : f32
    %17 = vector.broadcast %cst_17 : f32 to vector<16x16xf32>
    %18 = arith.maximumf %16, %17 : vector<16x16xf32>
    %19 = arith.truncf %18 : vector<16x16xf32> to vector<16x16xbf16>
    %20 = vector.shape_cast %19 : vector<16x16xbf16> to vector<2x8x16xbf16>
    %c0_18 = arith.constant 0 : index
    %c2_19 = arith.constant 2 : index
    %c0_20 = arith.constant 0 : index
    %21 = vector.load %arg9[%c0_18, %c2_19, %c0_20] : memref<2x12x16xbf16, #tpu.memory_space<vmem>>, vector<2x8x16xbf16>
    tpu.vector_store %arg9[%c0_18, %c2_19, %c0_20], %20 {strides = array<i32>} : memref<2x12x16xbf16, #tpu.memory_space<vmem>>, vector<2x8x16xbf16>,
    %c0_21 = arith.constant 0 : index
    %c1_22 = arith.constant 1 : index
    %c0_23 = arith.constant 0 : index
    %22 = vector.load %arg9[%c0_21, %c1_22, %c0_23] : memref<2x12x16xbf16, #tpu.memory_space<vmem>>, vector<2x8x16xbf16>
    %23 = vector.shape_cast %22 : vector<2x8x16xbf16> to vector<16x16xbf16>
    %c0_24 = arith.constant 0 : index
    %c2_25 = arith.constant 2 : index
    %c0_26 = arith.constant 0 : index
    %24 = vector.load %arg9[%c0_24, %c2_25, %c0_26] : memref<2x12x16xbf16, #tpu.memory_space<vmem>>, vector<2x8x16xbf16>
    %25 = vector.shape_cast %24 : vector<2x8x16xbf16> to vector<16x16xbf16>
    %c0_27 = arith.constant 0 : index
    %c3_28 = arith.constant 3 : index
    %c0_29 = arith.constant 0 : index
    %26 = vector.load %arg9[%c0_27, %c3_28, %c0_29] : memref<2x12x16xbf16, #tpu.memory_space<vmem>>, vector<2x8x16xbf16>
    %27 = vector.shape_cast %26 : vector<2x8x16xbf16> to vector<16x16xbf16>
    %c0_30 = arith.constant 0 : index
    %c1_31 = arith.constant 1 : index
    %c0_32 = arith.constant 0 : index
    %28 = vector.load %arg2[%c0_30, %c1_31, %c0_32] : memref<2x12x8xbf16, #tpu.memory_space<vmem>>, vector<2x8x8xbf16>
    %29 = vector.shape_cast %28 : vector<2x8x8xbf16> to vector<16x8xbf16>
    %c0_33 = arith.constant 0 : index
    %c2_34 = arith.constant 2 : index
    %c0_35 = arith.constant 0 : index
    %30 = vector.load %arg2[%c0_33, %c2_34, %c0_35] : memref<2x12x8xbf16, #tpu.memory_space<vmem>>, vector<2x8x8xbf16>
    %31 = vector.shape_cast %30 : vector<2x8x8xbf16> to vector<16x8xbf16>
    %c0_36 = arith.constant 0 : index
    %c3_37 = arith.constant 3 : index
    %c0_38 = arith.constant 0 : index
    %32 = vector.load %arg2[%c0_36, %c3_37, %c0_38] : memref<2x12x8xbf16, #tpu.memory_space<vmem>>, vector<2x8x8xbf16>
    %33 = vector.shape_cast %32 : vector<2x8x8xbf16> to vector<16x8xbf16>
    %c0_39 = arith.constant 0 : index
    %c0_40 = arith.constant 0 : index
    %c0_41 = arith.constant 0 : index
    %34 = vector.load %arg4[%c0_39, %c0_40, %c0_41] : memref<3x16x16xbf16, #tpu.memory_space<vmem>>, vector<1x16x16xbf16>
    %35 = vector.shape_cast %34 : vector<1x16x16xbf16> to vector<16x16xbf16>
    %cst_42 = arith.constant dense<0.000000e+00> : vector<16x16xf32>
    %36 = tpu.matmul %23, %35, %cst_42 {dimension_numbers = #tpu.dot_dimension_numbers<[1], [0], [0], [1], [0, 0, 1, 1], [], []>} : vector<16x16xbf16>, vector<16x16xbf16>, vector<16x16xf32> -> vector<16x16xf32>
    %c1_43 = arith.constant 1 : index
    %c0_44 = arith.constant 0 : index
    %c0_45 = arith.constant 0 : index
    %37 = vector.load %arg4[%c1_43, %c0_44, %c0_45] : memref<3x16x16xbf16, #tpu.memory_space<vmem>>, vector<1x16x16xbf16>
    %38 = vector.shape_cast %37 : vector<1x16x16xbf16> to vector<16x16xbf16>
    %cst_46 = arith.constant dense<0.000000e+00> : vector<16x16xf32>
    %39 = tpu.matmul %25, %38, %cst_46 {dimension_numbers = #tpu.dot_dimension_numbers<[1], [0], [0], [1], [0, 0, 1, 1], [], []>} : vector<16x16xbf16>, vector<16x16xbf16>, vector<16x16xf32> -> vector<16x16xf32>
    %40 = arith.addf %36, %39 : vector<16x16xf32>
    %c2_47 = arith.constant 2 : index
    %c0_48 = arith.constant 0 : index
    %c0_49 = arith.constant 0 : index
    %41 = vector.load %arg4[%c2_47, %c0_48, %c0_49] : memref<3x16x16xbf16, #tpu.memory_space<vmem>>, vector<1x16x16xbf16>
    %42 = vector.shape_cast %41 : vector<1x16x16xbf16> to vector<16x16xbf16>
    %cst_50 = arith.constant dense<0.000000e+00> : vector<16x16xf32>
    %43 = tpu.matmul %27, %42, %cst_50 {dimension_numbers = #tpu.dot_dimension_numbers<[1], [0], [0], [1], [0, 0, 1, 1], [], []>} : vector<16x16xbf16>, vector<16x16xbf16>, vector<16x16xf32> -> vector<16x16xf32>
    %44 = arith.addf %40, %43 : vector<16x16xf32>
    %c0_51 = arith.constant 0 : index
    %c0_52 = arith.constant 0 : index
    %c0_53 = arith.constant 0 : index
    %45 = vector.load %arg5[%c0_51, %c0_52, %c0_53] : memref<3x8x16xbf16, #tpu.memory_space<vmem>>, vector<1x8x16xbf16>
    %46 = vector.shape_cast %45 : vector<1x8x16xbf16> to vector<8x16xbf16>
    %cst_54 = arith.constant dense<0.000000e+00> : vector<16x16xf32>
    %47 = tpu.matmul %29, %46, %cst_54 {dimension_numbers = #tpu.dot_dimension_numbers<[1], [0], [0], [1], [0, 0, 1, 1], [], []>} : vector<16x8xbf16>, vector<8x16xbf16>, vector<16x16xf32> -> vector<16x16xf32>
    %48 = arith.addf %44, %47 : vector<16x16xf32>
    %c1_55 = arith.constant 1 : index
    %c0_56 = arith.constant 0 : index
    %c0_57 = arith.constant 0 : index
    %49 = vector.load %arg5[%c1_55, %c0_56, %c0_57] : memref<3x8x16xbf16, #tpu.memory_space<vmem>>, vector<1x8x16xbf16>
    %50 = vector.shape_cast %49 : vector<1x8x16xbf16> to vector<8x16xbf16>
    %cst_58 = arith.constant dense<0.000000e+00> : vector<16x16xf32>
    %51 = tpu.matmul %31, %50, %cst_58 {dimension_numbers = #tpu.dot_dimension_numbers<[1], [0], [0], [1], [0, 0, 1, 1], [], []>} : vector<16x8xbf16>, vector<8x16xbf16>, vector<16x16xf32> -> vector<16x16xf32>
    %52 = arith.addf %48, %51 : vector<16x16xf32>
    %c2_59 = arith.constant 2 : index
    %c0_60 = arith.constant 0 : index
    %c0_61 = arith.constant 0 : index
    %53 = vector.load %arg5[%c2_59, %c0_60, %c0_61] : memref<3x8x16xbf16, #tpu.memory_space<vmem>>, vector<1x8x16xbf16>
    %54 = vector.shape_cast %53 : vector<1x8x16xbf16> to vector<8x16xbf16>
    %cst_62 = arith.constant dense<0.000000e+00> : vector<16x16xf32>
    %55 = tpu.matmul %33, %54, %cst_62 {dimension_numbers = #tpu.dot_dimension_numbers<[1], [0], [0], [1], [0, 0, 1, 1], [], []>} : vector<16x8xbf16>, vector<8x16xbf16>, vector<16x16xf32> -> vector<16x16xf32>
    %56 = arith.addf %52, %55 : vector<16x16xf32>
    %57 = vector.broadcast %2 : vector<1x16xf32> to vector<16x16xf32>
    %58 = arith.mulf %56, %57 : vector<16x16xf32>
    %59 = vector.broadcast %3 : vector<1x16xf32> to vector<16x16xf32>
    %60 = arith.addf %58, %59 : vector<16x16xf32>
    %cst_63 = arith.constant 0.000000e+00 : f32
    %61 = vector.broadcast %cst_63 : f32 to vector<16x16xf32>
    %62 = arith.maximumf %60, %61 : vector<16x16xf32>
    %63 = arith.truncf %62 : vector<16x16xf32> to vector<16x16xbf16>
    %64 = vector.shape_cast %63 : vector<16x16xbf16> to vector<2x8x16xbf16>
    %c0_64 = arith.constant 0 : index
    %c2_65 = arith.constant 2 : index
    %c0_66 = arith.constant 0 : index
    %65 = vector.load %arg9[%c0_64, %c2_65, %c0_66] : memref<2x12x16xbf16, #tpu.memory_space<vmem>>, vector<2x8x16xbf16>
    tpu.vector_store %arg9[%c0_64, %c2_65, %c0_66], %64 {strides = array<i32>} : memref<2x12x16xbf16, #tpu.memory_space<vmem>>, vector<2x8x16xbf16>,
    %c0_67 = arith.constant 0 : index
    %c1_68 = arith.constant 1 : index
    %c0_69 = arith.constant 0 : index
    %66 = vector.load %arg9[%c0_67, %c1_68, %c0_69] : memref<2x12x16xbf16, #tpu.memory_space<vmem>>, vector<2x8x16xbf16>
    %67 = vector.shape_cast %66 : vector<2x8x16xbf16> to vector<16x16xbf16>
    %c0_70 = arith.constant 0 : index
    %c2_71 = arith.constant 2 : index
    %c0_72 = arith.constant 0 : index
    %68 = vector.load %arg9[%c0_70, %c2_71, %c0_72] : memref<2x12x16xbf16, #tpu.memory_space<vmem>>, vector<2x8x16xbf16>
    %69 = vector.shape_cast %68 : vector<2x8x16xbf16> to vector<16x16xbf16>
    %c0_73 = arith.constant 0 : index
    %c3_74 = arith.constant 3 : index
    %c0_75 = arith.constant 0 : index
    %70 = vector.load %arg9[%c0_73, %c3_74, %c0_75] : memref<2x12x16xbf16, #tpu.memory_space<vmem>>, vector<2x8x16xbf16>
    %71 = vector.shape_cast %70 : vector<2x8x16xbf16> to vector<16x16xbf16>
    %c0_76 = arith.constant 0 : index
    %c0_77 = arith.constant 0 : index
    %c0_78 = arith.constant 0 : index
    %72 = vector.load %arg6[%c0_76, %c0_77, %c0_78] : memref<3x16x16xbf16, #tpu.memory_space<vmem>>, vector<1x16x16xbf16>
    %73 = vector.shape_cast %72 : vector<1x16x16xbf16> to vector<16x16xbf16>
    %cst_79 = arith.constant dense<0.000000e+00> : vector<16x16xf32>
    %74 = tpu.matmul %67, %73, %cst_79 {dimension_numbers = #tpu.dot_dimension_numbers<[1], [0], [0], [1], [0, 0, 1, 1], [], []>} : vector<16x16xbf16>, vector<16x16xbf16>, vector<16x16xf32> -> vector<16x16xf32>
    %c1_80 = arith.constant 1 : index
    %c0_81 = arith.constant 0 : index
    %c0_82 = arith.constant 0 : index
    %75 = vector.load %arg6[%c1_80, %c0_81, %c0_82] : memref<3x16x16xbf16, #tpu.memory_space<vmem>>, vector<1x16x16xbf16>
    %76 = vector.shape_cast %75 : vector<1x16x16xbf16> to vector<16x16xbf16>
    %cst_83 = arith.constant dense<0.000000e+00> : vector<16x16xf32>
    %77 = tpu.matmul %69, %76, %cst_83 {dimension_numbers = #tpu.dot_dimension_numbers<[1], [0], [0], [1], [0, 0, 1, 1], [], []>} : vector<16x16xbf16>, vector<16x16xbf16>, vector<16x16xf32> -> vector<16x16xf32>
    %78 = arith.addf %74, %77 : vector<16x16xf32>
    %c2_84 = arith.constant 2 : index
    %c0_85 = arith.constant 0 : index
    %c0_86 = arith.constant 0 : index
    %79 = vector.load %arg6[%c2_84, %c0_85, %c0_86] : memref<3x16x16xbf16, #tpu.memory_space<vmem>>, vector<1x16x16xbf16>
    %80 = vector.shape_cast %79 : vector<1x16x16xbf16> to vector<16x16xbf16>
    %cst_87 = arith.constant dense<0.000000e+00> : vector<16x16xf32>
    %81 = tpu.matmul %71, %80, %cst_87 {dimension_numbers = #tpu.dot_dimension_numbers<[1], [0], [0], [1], [0, 0, 1, 1], [], []>} : vector<16x16xbf16>, vector<16x16xbf16>, vector<16x16xf32> -> vector<16x16xf32>
    %82 = arith.addf %78, %81 : vector<16x16xf32>
    %83 = vector.broadcast %4 : vector<1x16xf32> to vector<16x16xf32>
    %84 = arith.mulf %82, %83 : vector<16x16xf32>
    %85 = vector.broadcast %5 : vector<1x16xf32> to vector<16x16xf32>
    %86 = arith.addf %84, %85 : vector<16x16xf32>
    %cst_88 = arith.constant 0.000000e+00 : f32
    %87 = vector.broadcast %cst_88 : f32 to vector<16x16xf32>
    %88 = arith.maximumf %86, %87 : vector<16x16xf32>
    %89 = vector.shape_cast %88 : vector<16x16xf32> to vector<2x8x16xf32>
    %90 = arith.truncf %89 : vector<2x8x16xf32> to vector<2x8x16xbf16>
    %c0_89 = arith.constant 0 : index
    %c0_90 = arith.constant 0 : index
    %c0_91 = arith.constant 0 : index
    %91 = vector.load %arg8[%c0_89, %c0_90, %c0_91] : memref<2x8x16xbf16, #tpu.memory_space<vmem>>, vector<2x8x16xbf16>
    tpu.vector_store %arg8[%c0_89, %c0_90, %c0_91], %90 {strides = array<i32>} : memref<2x8x16xbf16, #tpu.memory_space<vmem>>, vector<2x8x16xbf16>,
    return
  }
  func.func @transform_0(%arg0: i32) -> (i32, i32, i32) {
    %c0_i32 = arith.constant 0 : i32
    %c0_i32_0 = arith.constant 0 : i32
    %c0_i32_1 = arith.constant 0 : i32
    return %arg0, %c0_i32, %c0_i32_0 : i32, i32, i32
  }
  func.func @transform_1(%arg0: i32) -> (i32, i32, i32) {
    %c0_i32 = arith.constant 0 : i32
    %c0_i32_0 = arith.constant 0 : i32
    %c0_i32_1 = arith.constant 0 : i32
    return %arg0, %c0_i32, %c0_i32_0 : i32, i32, i32
  }
  func.func @transform_2(%arg0: i32) -> (i32, i32) {
    %c0_i32 = arith.constant 0 : i32
    %c0_i32_0 = arith.constant 0 : i32
    %c0_i32_1 = arith.constant 0 : i32
    return %c0_i32, %c0_i32_0 : i32, i32
  }
  func.func @transform_3(%arg0: i32) -> (i32, i32, i32) {
    %c0_i32 = arith.constant 0 : i32
    %c0_i32_0 = arith.constant 0 : i32
    %c0_i32_1 = arith.constant 0 : i32
    %c0_i32_2 = arith.constant 0 : i32
    return %c0_i32, %c0_i32_0, %c0_i32_1 : i32, i32, i32
  }
  func.func @transform_4(%arg0: i32) -> (i32, i32, i32) {
    %c0_i32 = arith.constant 0 : i32
    %c0_i32_0 = arith.constant 0 : i32
    %c0_i32_1 = arith.constant 0 : i32
    %c0_i32_2 = arith.constant 0 : i32
    return %c0_i32, %c0_i32_0, %c0_i32_1 : i32, i32, i32
  }
  func.func @transform_5(%arg0: i32) -> (i32, i32, i32) {
    %c0_i32 = arith.constant 0 : i32
    %c0_i32_0 = arith.constant 0 : i32
    %c0_i32_1 = arith.constant 0 : i32
    %c0_i32_2 = arith.constant 0 : i32
    return %c0_i32, %c0_i32_0, %c0_i32_1 : i32, i32, i32
  }
  func.func @transform_6(%arg0: i32) -> (i32, i32) {
    %c0_i32 = arith.constant 0 : i32
    %c0_i32_0 = arith.constant 0 : i32
    %c0_i32_1 = arith.constant 0 : i32
    return %c0_i32, %c0_i32_0 : i32, i32
  }
  func.func @transform_7(%arg0: i32) -> (i32, i32, i32) {
    %c0_i32 = arith.constant 0 : i32
    %c0_i32_0 = arith.constant 0 : i32
    %c0_i32_1 = arith.constant 0 : i32
    return %arg0, %c0_i32, %c0_i32_0 : i32, i32, i32
  }
}

</mosaic_0001>

<bundles_post_ra>
// kernel: tpu_custom_call.1
= control target key start
LH: loop header
LB: loop body
LE: loop exit
PB: predicated region body
PF: predicated region fallthrough
CT: control target
= control target key end

     0   :  { %12 = vsyncpa [#allocation4], 0  ;;  %s2023_s0 = inlined_call_operand.vmem [shape: bf16[8,8,8], index: 0, kind: input, shape index: {}]   ;;  %s2024_s1 = inlined_call_operand.vmem [shape: bf16[8,12,8], index: 1, kind: input, shape index: {}]   ;;  %s2025_s2 = inlined_call_operand.hbm [shape: bf16[8,16], index: 2, kind: input, shape index: {}]   ;;  %s2026_s3 = inlined_call_operand.vmem [shape: bf16[3,16,16], index: 3, kind: input, shape index: {}]   ;;  %s2027_s4 = inlined_call_operand.vmem [shape: bf16[3,8,16], index: 4, kind: input, shape index: {}]   ;;  %s2028_s5 = inlined_call_operand.vmem [shape: bf16[3,16,16], index: 5, kind: input, shape index: {}]   ;;  %s2029_s6 = inlined_call_operand.vmem [shape: f32[6,16], index: 6, kind: input, shape index: {}]   ;;  %s2030_s7 = inlined_call_operand.hbm [shape: bf16[8,8,16], index: 7, kind: output, shape index: {}]  }
   0x1   :  { %13 = vsyncpa [#allocation5], 0 }
   0x2   :  { %15 = vsyncpa [#allocation5 + $0x1], 0  ;;  %s1719_s24 = smov 0   ;;  %s1721_s25 = smov 0  }
   0x3   :  { %s1723_s26 = smov 0   ;;  %s1725_s27 = smov 0  }
   0x4 LB: > { %s1740_s28 = sadd.s32 4294967295, %s1670_s27   ;;  %s1333_s29 = sadd.s32 4294967294, %s1670_s27   ;;  %s1670_s27 = sphi %s1725_s27, %s2052_s27   ;;  %s1666_s26 = sphi %s1723_s26, %s2051_s26   ;;  %s1662_s25 = sphi %s1721_s25, %s2050_s25   ;;  %s1658_s24 = sphi %s1719_s24, %s2049_s24  }
   0x5   : > { %s1744_s30 = sadd.s32 1, %s1670_s27   ;;  %s185_s8 = sadd.s32 1, %s1666_s26 }
   0x6   : > { %s182_s9 = ssub.s32 %s1670_s27, %s1744_s30  ;;  %p195_p0 = scmp.ne.s32.totalorder %s1666_s26, %s1662_s25 }
   0x7   : > { %p183_p1 = scmp.eq.s32.totalorder %s182_s9, 0  ;;  %p196_p2 = scmp.eq.s32.totalorder %s1740_s28, 3 }
   0x8   : > { %p201_p3 = scmp.ne.s32.totalorder %s1662_s25, %s1658_s24  ;;  %p202_p4 = scmp.eq.s32.totalorder %s1333_s29, 3 }
   0x9   : > { %s1755_s10 = scalar_select %p183_p1, %s1666_s26, %s185_s8  }
   0xa   : > { %p1757_p5 = por %p196_p2, %p195_p0  ;;  %p1761_p6 = por %p202_p4, %p201_p3 }
   0xb   : > { %p1334_p7 = scmp.ge.s32.totalorder %s1670_s27, 1  ;;  %p209_p8 = scmp.lt.s32.totalorder %s1670_s27, 5 }
   0xc   : > { %s2034_s11 = scalar_select %p1757_p5, 1, 0 }
   0xd   : > { %s2035_s12 = scalar_select %p1761_p6, 1, 0 }
   0xe   : > { %p2031_p9 = scmp.eq.s32.totalorder %s1740_s28, 0  ;;  %p1768_p10 = pnand %p1334_p7, %p209_p8 }
   0xf   : > { %s1672_s14 = smov [#allocation3]   ;;  %s1576_s19 = scalar_lea.hbm %s2025_s2, 64 }
  0x10   : > { %s2036_s13 = scalar_select %p1768_p10, 1, 0 }
  0x11   : > { %s222_s15 = sshll.u32 %s1672_s14, 4  ;;  %p1520_p11 = pneg %p1768_p10  ;;  %s223_s15 = int_to_ptr.vmem [resolvable:$true] %s222_s15 }
  0x12   : > { %p1577_p13 = scmp.ne.s32.totalorder %s2025_s2, %s1576_s19  ;;  %p1583_p3 = scmp.lt.u32.totalorder %s1576_s19, %s2025_s2 }
  0x13   : > { %p1776_p12 = pnand %p2031_p9, %p1520_p11 }
  0x15   : > { %p1578_p0 = pneg %p1776_p12 }
  0x17   : > { %p1579_p1 = pnand %p1578_p0, %p1577_p13 }
  0x19   : > { %p1580_p2 = pneg %p1579_p1 }
  0x1b   : > { %p1585_p4 = pnand %p1583_p3, %p1580_p2 }
  0x1d   : > { %1588 = shalt.err (!%p1585_p4)
}
  0x1e   : > { %s1589_s29 = scalar_lea.vmem %s223_s15, 64  ;;  %p1597_p9 = scmp.lt.s32.totalorder %s223_s15, %s223_s15 }
  0x1f   : > { %p1590_p7 = scmp.ne.s32.totalorder %s223_s15, %s1589_s29  ;;  %p1598_p6 = scmp.lt.s32.totalorder %s1589_s29, %s1589_s29 }
  0x21   : > { %p1592_p8 = pnand %p1590_p7, %p1578_p0  ;;  %p1599_p5 = por %p1598_p6, %p1597_p9 }
  0x23   : > { %p1593_p11 = pneg %p1592_p8 }
  0x25   : > { %p1600_p10 = pnand %p1599_p5, %p1593_p11 }
  0x27   : > { %1603 = shalt.err (!%p1600_p10)
}
  0x28   : > { %1523 = dma.hbm_to_vmem [thread:$0]  (!%p1776_p12), %s2025_s2, 64, %s223_s15, [#allocation4]  }
  0x29   : > { %p2038_p13 = scmp.ne.s32.totalorder %s2036_s13, 0 }
  0x2a   : > { %p2039_p1 = scmp.eq.s32.totalorder (!%p2038_p13), %s1740_s28, 0 }
  0x2b   : > { %266 = sbr.rel (%p2038_p13) target bundleno = 853 (0x355), region = 48 }
  0x32   : > { %1649 = dma.done.wait (%p2039_p1), [#allocation4], 64   ;;  %p2040_p0 = pmov %p2039_p1 }
  0x33   : > { %s1340_s14 = sshll.u32 %s1740_s28, 1  ;;  %v1673_v0 = vmov 0.0   ;;  %vm1674_vm0 = vmmov 0   ;;  %vm325_vm1 = vcmask 122880   ;;  %vm328_vm2 = vcmask 123905   ;;  %v1570_v5 = vld [vmem:[%s2026_s3 + $0x8] sm:$0xff]  }
  0x34   : > { %1651 = vsyncadd (%p2040_p0), [#allocation4], 4294967232  ;;  %1428 = vmatprep.subr.bf16.mxu0 %v1673_v0  ;;  %1430 = vmatprep.mubr.msk.bf16.mxu0 %vm1674_vm0, %v1673_v0  ;;  %p305_p5 = scmp.lt.s32.totalorder %s1340_s14, 7  ;;  %v1675_v1 = vmov 0   ;;  %vm343_vm3 = vcmask 1043456   ;;  %vm339_vm4 = vcmask 64512  }
  0x35   : > { %326 = vst.msk [vmem:[#allocation2] sm:$0x1] %vm325_vm1, %v1675_v1  ;;  %327 = vst.msk [vmem:[#allocation2 + $0x8] sm:$0x1] %vm325_vm1, %v1675_v1  ;;  %1440 = vmatprep.subr.bf16.mxu1 %v1673_v0  ;;  %1442 = vmatprep.mubr.msk.bf16.mxu1 %vm1674_vm0, %v1673_v0  ;;  %v333_v2 = vld [vmem:[#allocation3] sm:$0xf] }
  0x36   : > { %329 = vst.msk [vmem:[#allocation2 + $0x4] sm:$0x2] %vm328_vm2, %v1675_v1  ;;  %330 = vst.msk [vmem:[#allocation2 + $0xc] sm:$0x2] %vm328_vm2, %v1675_v1  ;;  %s2054_s14 = smov (!%p305_p5, %s1340_s14), 7  ;;  %v345_v3 = vsel %vm343_vm3, %v333_v2, 0 }
  0x37   : > { %s1341_s13 = sshll.u32 %s2054_s14, 2  ;;  %1429 = vmatpush3.bf16.msra.mxu0 %v345_v3  ;;  %v1571_v6 = vld [vmem:[%s2026_s3] sm:$0xff]   ;;  %vm416_vm5 = vcmask 125953   ;;  %vm462_vm6 = vcmask 1042432   ;;  %vm463_vm7 = vcmask 1046532   ;;  %s1402_s9 = sshll.u32 %s2054_s14, 3 }
  0x38   : > { %s308_s17 = scalar_lea.vmem %s2023_s0, %s1341_s13  ;;  %1434 = vmatprep.subr.bf16.mxu0 %v1673_v0  ;;  %1441 = vmatpush3.bf16.msra.mxu1 %v1571_v6  ;;  %v1347_v7 = vld [vmem:[%s2029_s6] ss:$0 sm:$0xff]  ;;  %v1348_v8 = vld [vmem:[%s2029_s6 + $0x1] ss:$0 sm:$0xff]  ;;  %vm425_vm8 = vsmask.f32 3328  ;;  %vm1841_vm10 = vmor %vm462_vm6, %vm463_vm7  ;;  %s1853_s14 = scalar_lea.vmem %s2024_s1, %s1402_s9 }
  0x39   : > { %v1569_v4 = vld [vmem:[%s308_s17] sm:$0xff]   ;;  %1446 = vmatprep.subr.bf16.mxu1 %v1673_v0  ;;  %vm426_vm9 = vsmask.f32 7440  ;;  %vm612_vm11 = vcmask 130048   ;;  %v1572_v1 = vld [vmem:[%s2026_s3 + $0x10] sm:$0xff]   ;;  %s301_s20 = sand.u32 1, %s1662_s25  }
  0x3a   : > { %1431 = vmatmul.mubr.msk.bf16.vlgmr.msra.gmra.mrb[0].mxu0 %vm339_vm4, %v1569_v4  ;;  %vm1857_vm12 = vmor %vm425_vm8, %vm426_vm9  ;;  %vm475_vm13 = vsmask.f32 2304  ;;  %vm476_vm14 = vsmask.f32 6416  ;;  %s1339_s23 = sshll.u32 %s301_s20, 3  ;;  %s1407_s9 = sshll.u32 %s1740_s28, 7 }
  0x3b   : > { %1436 = vmatprep.mubr.msk.bf16.mxu0 %vm1674_vm0, %v1673_v0  ;;  %1435 = vmatpush3.bf16.msra.mxu0 %v1570_v5  ;;  %vm1878_vm15 = vmor %vm475_vm13, %vm476_vm14  ;;  %s303_s13 = scalar_lea.vmem [#allocation6], %s1339_s23  ;;  %s1978_s17 = scalar_lea.hbm %s2030_s7, %s1407_s9 }
  0x3c   : > { %1470 = vmatprep.subr.bf16.mxu0 %v1673_v0  ;;  %s1247_s15 = sshll.u32 %s303_s13, 4  ;;  %s1982_s18 = scalar_lea.sflag [#allocation5], %s301_s20  ;;  %s1980_s15 = int_to_ptr.vmem [resolvable:$true] %s1247_s15 }
  0x3d   : > { %s1604_s28 = scalar_lea.vmem %s1980_s15, 128  ;;  %p2047_p9 = scmp.ne.s32.totalorder %s2034_s11, 0 }
  0x3e   : > { %p1605_p6 = scmp.ne.s32.totalorder %s1980_s15, %s1604_s28  ;;  %s1676_s19 = smov [#allocation6]  }
  0x3f   : > { %s1608_s21 = sshll.u32 %s1676_s19, 4  ;;  %s1609_s21 = int_to_ptr.vmem [resolvable:$false] %s1608_s21 }
  0x40   : > { %p1606_p10 = pnand %p1605_p6, %p2047_p9  ;;  %s1610_s22 = scalar_lea.vmem %s1609_s21, 256 }
  0x41   : > { %p1611_p2 = scmp.lt.s32.totalorder %s1980_s15, %s1609_s21  ;;  %p1612_p3 = scmp.lt.s32.totalorder %s1610_s22, %s1604_s28 }
  0x42   : > { %p1607_p12 = pneg %p1606_p10 }
  0x43   : > { %p1613_p4 = por %p1612_p3, %p1611_p2 }
  0x45   : > { %p1614_p7 = pnand %p1613_p4, %p1607_p12 }
 0x10d   : > { %v381_v9 = vpop.f32.mrb[0].mxu0 }
 0x10e   : > { %v392_v10 = vmul.f32 %v1347_v7, %v381_v9  ;;  %v1432_v11 = vpop.f32.mrb[1].mxu0 }
 0x10f   : > { %v384_v12 = vpop.f32.mrb[2].mxu0  ;;  %v516_v11 = vld [vmem:[%s1853_s14 + $0x8] sm:$0xf] }
 0x110   : > { %v398_v13 = vadd.f32 %v1348_v8, %v392_v10  ;;  %v393_v14 = vmul.f32 %v1347_v7, %v384_v12  ;;  %v1433_v15 = vpop.f32.mrb[3].mxu0  ;;  %v514_v10 = vld [vmem:[%s1853_s14] sm:$0xf] }
 0x112   : > { %v400_v16 = vmax.f32 %v398_v13, 0.0  ;;  %v399_v17 = vadd.f32 %v1348_v8, %v393_v14 }
 0x114   : > { %v1403_v18 = vpack.c.bf16 %v400_v16, %v400_v16  ;;  %v401_v19 = vmax.f32 %v399_v17, 0.0  ;;  %v519_v16 = vshrl.u32 %v514_v10, 16  ;;  %v522_v17 = vshll.u32 %v514_v10, 16 }
 0x116   : > { %v408_v20 = vrot.slane %v1403_v18, 7  ;;  %v1404_v21 = vpack.c.bf16 %v401_v19, %v401_v19  ;;  %v533_v18 = vshrl.u32 %v516_v11, 16 }
 0x118   : > { %v409_v22 = vrot.slane %v408_v20, 4  ;;  %417 = vst.msk [vmem:[#allocation2] sm:$0xe] %vm416_vm5, %v408_v20  ;;  %v410_v23 = vrot.slane %v1404_v21, 7 }
 0x11a   : > { %418 = vst.msk [vmem:[#allocation2 + $0x4] sm:$0x1] %vm325_vm1, %v409_v22  ;;  %v411_v24 = vrot.slane %v410_v23, 4  ;;  %v536_v22 = vshll.u32 %v516_v11, 16 }
 0x11b   : > { %419 = vst.msk [vmem:[#allocation2 + $0x8] sm:$0xe] %vm416_vm5, %v410_v23 }
 0x11c   : > { %420 = vst.msk [vmem:[#allocation2 + $0xc] sm:$0x1] %vm325_vm1, %v411_v24 }
 0x11f   : > { %v421_v25 = vld [vmem:[#allocation2] sm:$0xf] }
 0x120   : > { %v456_v26 = vld [vmem:[#allocation2] sm:$0xe]  ;;  %v429_v27 = vshrl.u32 %v421_v25, 16  ;;  %v432_v28 = vshll.u32 %v421_v25, 16  ;;  %v521_v25 = vrot.slane %v519_v16, 4 }
 0x121   : > { %v422_v29 = vld [vmem:[#allocation2 + $0x4] sm:$0x1]  ;;  %v1351_v37 = vrot.slane %v456_v26, 9  ;;  %v479_v43 = vshrl.u32 %v456_v26, 16  ;;  %v482_v55 = vshll.u32 %v456_v26, 16  ;;  %v524_v26 = vrot.slane %v522_v17, 5 }
 0x122   : > { %v457_v30 = vld [vmem:[#allocation2 + $0x8] sm:$0xe]  ;;  %v467_v32 = vrot.slane %v422_v29, 5  ;;  %v431_v33 = vrot.slane %v429_v27, 4  ;;  %v434_v34 = vrot.slane %v432_v28, 5  ;;  %v438_v44 = vshll.u32 %v422_v29, 16 }
 0x123   : > { %v423_v31 = vld [vmem:[#allocation2 + $0x8] sm:$0xf]  ;;  %v424_v35 = vld [vmem:[#allocation2 + $0xc] sm:$0x1]  ;;  %v1352_v40 = vrot.slane %v457_v30, 9  ;;  %v481_v57 = vrot.slane %v479_v43, 5 }
 0x124   : > { %v443_v38 = vshrl.u32 %v423_v31, 16  ;;  %v446_v39 = vshll.u32 %v423_v31, 16  ;;  %v471_v41 = vrot.slane %v424_v35, 5  ;;  %v435_v42 = vor.u32 %v434_v34, %v431_v33  ;;  %v474_v50 = vld [vmem:[#allocation2 + $0xc] sm:$0x3] }
 0x125   : > { %v452_v47 = vshll.u32 %v424_v35, 16  ;;  %v468_v48 = vsel %vm1841_vm10, %v1351_v37, %v467_v32  ;;  %v473_v54 = vld [vmem:[#allocation2 + $0x4] sm:$0x3]  ;;  %v497_v58 = vshrl.u32 %v457_v30, 16  ;;  %v500_v59 = vshll.u32 %v457_v30, 16 }
 0x126   : > { %v445_v45 = vrot.slane %v443_v38, 4  ;;  %v448_v46 = vrot.slane %v446_v39, 5  ;;  %v472_v49 = vsel %vm1841_vm10, %v1352_v40, %v471_v41  ;;  %v436_v52 = vrot.slane %v435_v42, 4  ;;  %v515_v29 = vld [vmem:[%s1853_s14 + $0x4] sm:$0x1] }
 0x127   : > { %v1357_v51 = vcombine.low %v468_v48, %v472_v49  ;;  %v440_v60 = vrot.slane %v438_v44, 5  ;;  %v454_v62 = vrot.slane %v452_v47, 5  ;;  %v506_v63 = vshrl.u32 %v474_v50, 16  ;;  %v517_v33 = vld [vmem:[%s1853_s14 + $0xc] sm:$0x1] }
 0x128   : > { %v449_v53 = vor.u32 %v448_v46, %v445_v45  ;;  %v488_v2 = vshrl.u32 %v473_v54, 16  ;;  %v499_v3 = vrot.slane %v497_v58, 5  ;;  %v502_v4 = vrot.slane %v500_v59, 6  ;;  %v768_v35 = vld [vmem:[%s2027_s4] sm:$0xf] }
 0x129   : > { %1437 = vmatmul.mubr.msk.bf16.vlgmr.msra.gmra.mrb[4].mxu0 %vm612_vm11, %v1357_v51  ;;  %v509_v5 = vshll.u32 %v474_v50, 16  ;;  %v441_v6 = vsel %vm1857_vm12, %v436_v52, %v440_v60  ;;  %v484_v8 = vrot.slane %v482_v55, 6  ;;  %v491_v9 = vshll.u32 %v473_v54, 16  ;;  %v1370_v50 = vld [vmem:[%s2027_s4 + $0x4] sm:$0xf] }
 0x12a   : > { %v450_v61 = vrot.slane %v449_v53, 4  ;;  %1472 = vmatprep.mubr.msk.bf16.mxu0 %vm1674_vm0, %v1673_v0  ;;  %v503_v13 = vor.u32 %v502_v4, %v499_v3  ;;  %v508_v14 = vrot.slane %v506_v63, 5  ;;  %v490_v20 = vrot.slane %v488_v2, 5  ;;  %v546_v52 = vld [vmem:[%s1853_s14] sm:$0xe] }
 0x12b   : > { %v511_v15 = vrot.slane %v509_v5, 6  ;;  %v485_v19 = vor.u32 %v484_v8, %v481_v57  ;;  %v493_v21 = vrot.slane %v491_v9, 6  ;;  %v535_v30 = vrot.slane %v533_v18, 4  ;;  %v547_v53 = vld [vmem:[%s1853_s14 + $0x8] sm:$0xe] }
 0x12c   : > { %v455_v7 = vsel %vm1857_vm12, %v450_v61, %v454_v62  ;;  %v504_v23 = vrot.slane %v503_v13, 4  ;;  %v538_v31 = vrot.slane %v536_v22, 5  ;;  %v528_v37 = vshll.u32 %v515_v29, 16  ;;  %v560_v60 = vld [vmem:[%s1853_s14 + $0x4] sm:$0x3] }
 0x12d   : > { %v1360_v12 = vcombine.low %v441_v6, %v455_v7  ;;  %v512_v24 = vor.u32 %v511_v15, %v508_v14  ;;  %v486_v27 = vrot.slane %v485_v19, 4  ;;  %v494_v28 = vor.u32 %v493_v21, %v490_v20  ;;  %v561_v62 = vld [vmem:[%s1853_s14 + $0xc] sm:$0x3]  ;;  %v1373_v13 = vld [vmem:[%s2027_s4 + $0x8] sm:$0xf] }
 0x12e   : > { %v525_v39 = vor.u32 %v524_v26, %v521_v25  ;;  %v539_v40 = vor.u32 %v538_v31, %v535_v30  ;;  %v542_v41 = vshll.u32 %v517_v33, 16  ;;  %v776_v43 = vsel %vm343_vm3, %v768_v35, 0  ;;  %v1376_v35 = vld [vmem:[%s2029_s6 + $0x2] ss:$0 sm:$0xff] }
 0x12f   : > { %1443 = vmatmul.mubr.msk.bf16.vlgmr.msra.gmra.mrb[0].mxu1 %vm612_vm11, %v1360_v12  ;;  %v513_v34 = vsel %vm1878_vm15, %v504_v23, %v512_v24  ;;  %v495_v38 = vsel %vm1878_vm15, %v486_v27, %v494_v28  ;;  %v530_v45 = vrot.slane %v528_v37, 5  ;;  %v830_v54 = vsel %vm343_vm3, %v1370_v50, 0 }
 0x130   : > { %1447 = vmatpush3.bf16.msra.mxu1 %v1572_v1  ;;  %1448 = vmatprep.mubr.msk.bf16.mxu1 %vm1674_vm0, %v1673_v0  ;;  %v1365_v42 = vcombine.low %v495_v38, %v513_v34  ;;  %v526_v44 = vrot.slane %v525_v39, 4  ;;  %v540_v46 = vrot.slane %v539_v40, 4  ;;  %v544_v47 = vrot.slane %v542_v41, 5  ;;  %v1377_v40 = vld [vmem:[%s2029_s6 + $0x3] ss:$0 sm:$0xff] }
 0x131   : > { %1452 = vmatprep.subr.bf16.mxu1 %v1673_v0  ;;  %v1353_v55 = vrot.slane %v546_v52, 9  ;;  %v554_v57 = vrot.slane %v515_v29, 5  ;;  %v1354_v58 = vrot.slane %v547_v53, 9  ;;  %v558_v59 = vrot.slane %v517_v33, 5  ;;  %v1573_v29 = vld [vmem:[%s2028_s5 + $0x8] sm:$0xff]  }
 0x132   : > { %v531_v48 = vsel %vm1857_vm12, %v526_v44, %v530_v45  ;;  %v545_v49 = vsel %vm1857_vm12, %v540_v46, %v544_v47  ;;  %v563_v61 = vshrl.u32 %v546_v52, 16  ;;  %v566_v63 = vshll.u32 %v546_v52, 16  ;;  %1471 = vmatpush3.bf16.msra.mxu0 %v1573_v29 }
 0x133   : > { %v1368_v51 = vcombine.low %v531_v48, %v545_v49  ;;  %v581_v1 = vshrl.u32 %v547_v53, 16  ;;  %v584_v2 = vshll.u32 %v547_v53, 16  ;;  %v555_v3 = vsel %vm1841_vm10, %v1353_v55, %v554_v57  ;;  %1476 = vmatprep.subr.bf16.mxu0 %v1673_v0 }
 0x134   : > { %v559_v4 = vsel %vm1841_vm10, %v1354_v58, %v558_v59  ;;  %v565_v5 = vrot.slane %v563_v61, 5  ;;  %v572_v6 = vshrl.u32 %v560_v60, 16  ;;  %v575_v7 = vshll.u32 %v560_v60, 16 }
 0x135   : > { %v590_v8 = vshrl.u32 %v561_v62, 16  ;;  %v568_v9 = vrot.slane %v566_v63, 6  ;;  %v583_v10 = vrot.slane %v581_v1, 5  ;;  %v586_v11 = vrot.slane %v584_v2, 6 }
 0x136   : > { %v593_v12 = vshll.u32 %v561_v62, 16  ;;  %v1371_v14 = vcombine.low %v555_v3, %v559_v4  ;;  %v574_v15 = vrot.slane %v572_v6, 5  ;;  %v577_v16 = vrot.slane %v575_v7, 6 }
 0x137   : > { %v569_v17 = vor.u32 %v568_v9, %v565_v5  ;;  %v587_v18 = vor.u32 %v586_v11, %v583_v10  ;;  %v592_v19 = vrot.slane %v590_v8, 5  ;;  %v884_v21 = vsel %vm343_vm3, %v1373_v13, 0 }
 0x138   : > { %v595_v20 = vrot.slane %v593_v12, 6  ;;  %v578_v23 = vor.u32 %v577_v16, %v574_v15  ;;  %v1574_v12 = vld [vmem:[%s2028_s5] sm:$0xff]  }
 0x139   : > { %v570_v22 = vrot.slane %v569_v17, 4  ;;  %v588_v24 = vrot.slane %v587_v18, 4 }
 0x13a   : > { %v596_v25 = vor.u32 %v595_v20, %v592_v19 }
 0x13b   : > { %1449 = vmatmul.mubr.msk.bf16.vlgmr.msra.gmra.mrb[0].mxu1 %vm612_vm11, %v1365_v42  ;;  %v579_v26 = vsel %vm1878_vm15, %v570_v22, %v578_v23 }
 0x13c   : > { %1453 = vmatpush3.bf16.msra.mxu1 %v776_v43  ;;  %1454 = vmatprep.mubr.msk.bf16.mxu1 %vm1674_vm0, %v1673_v0  ;;  %v597_v27 = vsel %vm1878_vm15, %v588_v24, %v596_v25 }
 0x13d   : > { %1458 = vmatprep.subr.bf16.mxu1 %v1673_v0  ;;  %v1374_v28 = vcombine.low %v579_v26, %v597_v27 }
 0x147   : > { %1455 = vmatmul.mubr.msk.bf16.vlgmr.msra.gmra.mrb[0].mxu1 %vm339_vm4, %v1368_v51 }
 0x148   : > { %1459 = vmatpush3.bf16.msra.mxu1 %v830_v54  ;;  %1460 = vmatprep.mubr.msk.bf16.mxu1 %vm1674_vm0, %v1673_v0 }
 0x149   : > { %1464 = vmatprep.subr.bf16.mxu1 %v1673_v0 }
 0x153   : > { %1461 = vmatmul.mubr.msk.bf16.vlgmr.msra.gmra.mrb[0].mxu1 %vm339_vm4, %v1371_v14 }
 0x154   : > { %1465 = vmatpush3.bf16.msra.mxu1 %v884_v21  ;;  %1466 = vmatprep.mubr.msk.bf16.mxu1 %vm1674_vm0, %v1673_v0 }
 0x15f   : > { %1467 = vmatmul.mubr.msk.bf16.vlgmr.msra.gmra.mrb[0].mxu1 %vm339_vm4, %v1374_v28 }
 0x1fc   : > { %v650_v30 = vpop.f32.mrb[4].mxu0 }
 0x1fd   : > { %v1438_v31 = vpop.f32.mrb[5].mxu0 }
 0x1fe   : > { %v653_v33 = vpop.f32.mrb[6].mxu0 }
 0x1ff   : > { %v1439_v34 = vpop.f32.mrb[7].mxu0 }
 0x232   : > { %v920_v37 = vpop.f32.mrb[0].mxu1 }
 0x233   : > { %v1488_v38 = vadd.f32 %v920_v37, %v650_v30  ;;  %v1468_v39 = vpop.f32.mrb[1].mxu1 }
 0x234   : > { %v923_v41 = vpop.f32.mrb[2].mxu1 }
 0x235   : > { %v933_v42 = vmul.f32 %v1488_v38, %v1376_v35  ;;  %v1489_v43 = vadd.f32 %v923_v41, %v653_v33  ;;  %v1469_v44 = vpop.f32.mrb[3].mxu1  ;;  %v1575_v38 = vld [vmem:[%s2028_s5 + $0x10] sm:$0xff]  }
 0x237   : > { %v939_v45 = vadd.f32 %v1377_v40, %v933_v42  ;;  %v934_v46 = vmul.f32 %v1489_v43, %v1376_v35 }
 0x239   : > { %v941_v47 = vmax.f32 %v939_v45, 0.0  ;;  %v940_v48 = vadd.f32 %v1377_v40, %v934_v46 }
 0x23b   : > { %v1405_v49 = vpack.c.bf16 %v941_v47, %v941_v47  ;;  %v942_v50 = vmax.f32 %v940_v48, 0.0 }
 0x23d   : > { %v949_v51 = vrot.slane %v1405_v49, 7  ;;  %v1406_v52 = vpack.c.bf16 %v942_v50, %v942_v50 }
 0x23f   : > { %v950_v53 = vrot.slane %v949_v51, 4  ;;  %957 = vst.msk [vmem:[#allocation2] sm:$0xe] %vm416_vm5, %v949_v51  ;;  %v951_v54 = vrot.slane %v1406_v52, 7 }
 0x241   : > { %958 = vst.msk [vmem:[#allocation2 + $0x4] sm:$0x1] %vm325_vm1, %v950_v53  ;;  %v952_v55 = vrot.slane %v951_v54, 4 }
 0x242   : > { %959 = vst.msk [vmem:[#allocation2 + $0x8] sm:$0xe] %vm416_vm5, %v951_v54 }
 0x243   : > { %960 = vst.msk [vmem:[#allocation2 + $0xc] sm:$0x1] %vm325_vm1, %v952_v55  ;;  %v1396_v55 = vld [vmem:[%s2029_s6 + $0x5] ss:$0 sm:$0xff] }
 0x246   : > { %v961_v57 = vld [vmem:[#allocation2] sm:$0xf] }
 0x247   : > { %v993_v58 = vld [vmem:[#allocation2] sm:$0xe]  ;;  %v966_v63 = vshrl.u32 %v961_v57, 16  ;;  %v969_v1 = vshll.u32 %v961_v57, 16 }
 0x248   : > { %v962_v59 = vld [vmem:[#allocation2 + $0x4] sm:$0x1]  ;;  %v1380_v5 = vrot.slane %v993_v58, 9  ;;  %v1010_v23 = vshrl.u32 %v993_v58, 16  ;;  %v1013_v26 = vshll.u32 %v993_v58, 16 }
 0x249   : > { %v994_v60 = vld [vmem:[#allocation2 + $0x8] sm:$0xe]  ;;  %v1001_v62 = vrot.slane %v962_v59, 5  ;;  %v968_v13 = vrot.slane %v966_v63, 4  ;;  %v971_v14 = vrot.slane %v969_v1, 5  ;;  %v975_v36 = vshll.u32 %v962_v59, 16 }
 0x24a   : > { %v963_v61 = vld [vmem:[#allocation2 + $0x8] sm:$0xf]  ;;  %v964_v2 = vld [vmem:[#allocation2 + $0xc] sm:$0x1]  ;;  %v1381_v6 = vrot.slane %v994_v60, 9  ;;  %v1028_v21 = vshrl.u32 %v994_v60, 16 }
 0x24b   : > { %v980_v3 = vshrl.u32 %v963_v61, 16  ;;  %v983_v4 = vshll.u32 %v963_v61, 16  ;;  %v1005_v7 = vrot.slane %v964_v2, 5  ;;  %v1002_v10 = vsel %vm1841_vm10, %v1380_v5, %v1001_v62  ;;  %v1008_v20 = vld [vmem:[#allocation2 + $0xc] sm:$0x3] }
 0x24c   : > { %v972_v17 = vor.u32 %v971_v14, %v968_v13  ;;  %v989_v18 = vshll.u32 %v964_v2, 16  ;;  %v1031_v22 = vshll.u32 %v994_v60, 16  ;;  %v977_v27 = vrot.slane %v975_v36, 5  ;;  %v1007_v28 = vld [vmem:[#allocation2 + $0x4] sm:$0x3] }
 0x24d   : > { %v982_v8 = vrot.slane %v980_v3, 4  ;;  %v985_v9 = vrot.slane %v983_v4, 5  ;;  %v1006_v11 = vsel %vm1841_vm10, %v1381_v6, %v1005_v7  ;;  %v1037_v29 = vshrl.u32 %v1008_v20, 16 }
 0x24e   : > { %v1384_v15 = vcombine.low %v1002_v10, %v1006_v11  ;;  %v973_v24 = vrot.slane %v972_v17, 4  ;;  %v991_v25 = vrot.slane %v989_v18, 5  ;;  %v1030_v31 = vrot.slane %v1028_v21, 5 }
 0x24f   : > { %v986_v16 = vor.u32 %v985_v9, %v982_v8  ;;  %v1033_v33 = vrot.slane %v1031_v22, 6  ;;  %v1040_v34 = vshll.u32 %v1008_v20, 16  ;;  %v1012_v35 = vrot.slane %v1010_v23, 5 }
 0x250   : > { %1473 = vmatmul.mubr.msk.bf16.vlgmr.msra.gmra.mrb[8].mxu0 %vm612_vm11, %v1384_v15  ;;  %v978_v37 = vsel %vm1857_vm12, %v973_v24, %v977_v27  ;;  %v1015_v39 = vrot.slane %v1013_v26, 6  ;;  %v1019_v40 = vshrl.u32 %v1007_v28, 16  ;;  %v1022_v41 = vshll.u32 %v1007_v28, 16 }
 0x251   : > { %1477 = vmatpush3.bf16.msra.mxu0 %v1574_v12  ;;  %1478 = vmatprep.mubr.msk.bf16.mxu0 %vm1674_vm0, %v1673_v0  ;;  %v987_v19 = vrot.slane %v986_v16, 4  ;;  %v1034_v43 = vor.u32 %v1033_v33, %v1030_v31  ;;  %v1039_v44 = vrot.slane %v1037_v29, 5  ;;  %v1042_v45 = vrot.slane %v1040_v34, 6 }
 0x252   : > { %1482 = vmatprep.subr.bf16.mxu0 %v1673_v0  ;;  %v1016_v56 = vor.u32 %v1015_v39, %v1012_v35  ;;  %v1021_v46 = vrot.slane %v1019_v40, 5  ;;  %v1024_v47 = vrot.slane %v1022_v41, 6 }
 0x253   : > { %v992_v30 = vsel %vm1857_vm12, %v987_v19, %v991_v25  ;;  %v1035_v48 = vrot.slane %v1034_v43, 4  ;;  %v1043_v49 = vor.u32 %v1042_v45, %v1039_v44 }
 0x254   : > { %v1387_v42 = vcombine.low %v978_v37, %v992_v30  ;;  %v1017_v50 = vrot.slane %v1016_v56, 4  ;;  %v1025_v51 = vor.u32 %v1024_v47, %v1021_v46 }
 0x255   : > { %v1044_v52 = vsel %vm1878_vm15, %v1035_v48, %v1043_v49 }
 0x256   : > { %v1026_v53 = vsel %vm1878_vm15, %v1017_v50, %v1025_v51 }
 0x257   : > { %v1392_v54 = vcombine.low %v1026_v53, %v1044_v52 }
 0x25c   : > { %1479 = vmatmul.mubr.msk.bf16.vlgmr.msra.gmra.mrb[8].mxu0 %vm612_vm11, %v1387_v42 }
 0x25d   : > { %1483 = vmatpush3.bf16.msra.mxu0 %v1575_v38  ;;  %1484 = vmatprep.mubr.msk.bf16.mxu0 %vm1674_vm0, %v1673_v0  ;;  %v1395_v0 = vld [vmem:[%s2029_s6 + $0x4] ss:$0 sm:$0xff]  ;;  %vm1230_vm0 = vcmask 125952  }
 0x268   : > { %1485 = vmatmul.mubr.msk.bf16.vlgmr.msra.gmra.mrb[8].mxu0 %vm612_vm11, %v1392_v54 }
 0x33b   : > { %v1205_v57 = vpop.f32.mrb[8].mxu0 }
 0x33c   : > { %v1218_v58 = vmul.f32 %v1395_v0, %v1205_v57  ;;  %v1486_v59 = vpop.f32.mrb[9].mxu0 }
 0x33d   : > { %v1208_v60 = vpop.f32.mrb[10].mxu0 }
 0x33e   : > { %v1224_v32 = vadd.f32 %v1396_v55, %v1218_v58  ;;  %v1219_v61 = vmul.f32 %v1395_v0, %v1208_v60  ;;  %v1487_v62 = vpop.f32.mrb[11].mxu0 }
 0x340   : > { %v1226_v63 = vmax.f32 %v1224_v32, 0.0  ;;  %v1225_v1 = vadd.f32 %v1396_v55, %v1219_v61 }
 0x342   : > { %v1228_v2 = vpack.c.bf16 %v1226_v63, %v1226_v63  ;;  %v1227_v3 = vmax.f32 %v1225_v1, 0.0 }
 0x344   : > { %1231 = vst.msk [vmem:[%s303_s13] sm:$0xf] %vm1230_vm0, %v1228_v2  ;;  %v1229_v4 = vpack.c.bf16 %v1227_v3, %v1227_v3 }
 0x346   : > { %1232 = vst.msk [vmem:[%s303_s13 + $0x4] sm:$0xf] %vm1230_vm0, %v1229_v4 }
 0x347   : > { %1617 = shalt.err (!%p1614_p7)
}
 0x348   : > { %s1618_s20 = scalar_lea.hbm %s1978_s17, 128  ;;  %s1622_s8 = scalar_lea.hbm %s2030_s7, 512 }
 0x349   : > { %p1619_p8 = scmp.ne.s32.totalorder %s1978_s17, %s1618_s20  ;;  %p1623_p1 = scmp.lt.u32.totalorder %s1978_s17, %s2030_s7 }
 0x34a   : > { %p1624_p0 = scmp.lt.u32.totalorder %s1622_s8, %s1618_s20  ;;  %p1626_p6 = scmp.lt.u32.totalorder %s1618_s20, %s1978_s17 }
 0x34b   : > { %p1620_p11 = pnand %p1619_p8, %p2047_p9 }
 0x34c   : > { %p1625_p5 = por %p1624_p0, %p1623_p1 }
 0x34d   : > { %p1621_p13 = pneg %p1620_p11 }
 0x34e   : > { %p1627_p10 = por %p1626_p6, %p1625_p5 }
 0x350   : > { %p1628_p12 = pnand %p1627_p10, %p1621_p13 }
 0x352   : > { %1631 = shalt.err (!%p1628_p12)
}
 0x353   : > { %s1677_s14 = smov 64   ;;  %s1678_s16 = smov 4  }
 0x354   : > { %1518 = dma.vmem_to_hbm [thread:$0]  (%p2047_p9), %s1980_s15, 128, %s1978_s17, %s1982_s18, %s1677_s14, %s1677_s14, %s1678_s16  }
 0x355 PF: > { %p1530_p2 = scmp.ge.s32.totalorder %s1670_s27, 2  ;;  %s1262_s28 = sand.u32 1, %s1658_s24  }
 0x356   : > { %p2048_p3 = scmp.ne.s32.totalorder %s2035_s12, 0  ;;  %s1263_s19 = scalar_lea.sflag [#allocation5], %s1262_s28 }
 0x358   : > { %p1525_p4 = pnand %p1530_p2, %p2048_p3 }
 0x35a   : > { %1653 = dma.done.wait (!%p1525_p4), %s1263_s19, 128  }
 0x35b   : > { %1655 = vsyncadd (!%p1525_p4), %s1263_s19, 4294967168  ;;  %p18_p7 = scmp.ge.s32.totalorder %s1744_s30, 6   ;;  %s2049_s24 = smov %s1662_s25 }
 0x35c   : > { %s2050_s25 = smov %s1666_s26  ;;  %s2051_s26 = smov %s1755_s10 }
 0x35d   : > { %s2052_s27 = smov %s1744_s30  ;;  %20 = sbr.rel (!%p18_p7) target bundleno = 4 (0x4), region = 97 }
 0x364   :  { %1268 = vsyncpa [#allocation4], 1 }
 0x365   :  { %1270 = vsyncpa [#allocation4 + $0x1], 1 }
 0x366   :  { %1271 = vsyncpa [#allocation5], 1 }
 0x367   :  { %1273 = vsyncpa [#allocation5 + $0x1], 1 }

</bundles_post_ra>
